<compile_context>
chip_gen: v5e
topology: v5e:2x2
jax: 0.10.0
libtpu: 0.0.40
codegen_flags: <defaults>
</compile_context>

<pallas_src>
import jax
import jax.numpy as jnp
from jax.experimental import pallas as pl
from jax.experimental.pallas import tpu as pltpu


def _round_up(x, m):
    return (x + m - 1) // m * m


def head_kernel(x_ref, w1_ref, b1_ref, w2_ref, b2_ref, o_ref):
    x = x_ref[...]                                              # (TN, M) f32
    m = x.shape[1]

    # --- KroneckerLayer #1 + CustomLinear(k=1), exploiting that v1 is a
    #     broadcast of x over C:  h1[i,a,c] = x[i,a]*colsum(w1)[c] + b1[c] ---
    w1_colsum = jnp.sum(w1_ref[...], axis=0, keepdims=True)     # (1, C)  tiny

    # --- KroneckerLayer #2 + ContractionLayer pushed through CustomLinear(k=2):
    #     d[i,c] = sum_a x[i,a]*h1[i,a,c]
    #            = (sum_a x[i,a]^2)*colsum(w1)[c] + (sum_a x[i,a])*b1[c]     ---
    s1 = jnp.sum(x, axis=1, keepdims=True)                      # (TN, 1)
    s2 = jnp.sum(x * x, axis=1, keepdims=True)                  # (TN, 1)
    d = s2 * w1_colsum + s1 * b1_ref[...]                       # (TN, C)  VPU only

    # --- remaining CustomLinear(k=2) applied after the trace (single small MXU
    #     matmul); bias b2 is summed over the M diagonal positions -> M*b2 ---
    o_ref[...] = (
        jnp.dot(d, w2_ref[...], preferred_element_type=jnp.float32)
        + m * b2_ref[...]
    )                                                           # (TN, C)


def head_forward(x, w1, b1, w2, b2, *, tile_n=None):
    n, m = x.shape
    c = w1.shape[0]

    if tile_n is None:
        tile_n = min(512, _round_up(n, 8))
    tile_n = _round_up(tile_n, 8)

    # Pad N to a multiple of the tile (padded rows are zeros, sliced off below).
    n_pad = _round_up(n, tile_n)
    if n_pad != n:
        x = jnp.pad(x, ((0, n_pad - n), (0, 0)))

    grid = (n_pad // tile_n,)
    out = pl.pallas_call(
        head_kernel,
        out_shape=jax.ShapeDtypeStruct((n_pad, c), jnp.float32),
        grid=grid,
        in_specs=[
            pl.BlockSpec((tile_n, m), lambda i: (i, 0)),   # x: tiled over N
            pl.BlockSpec((c, c), lambda i: (0, 0)),        # w1: VMEM-resident
            pl.BlockSpec((1, c), lambda i: (0, 0)),        # b1
            pl.BlockSpec((c, c), lambda i: (0, 0)),        # w2
            pl.BlockSpec((1, c), lambda i: (0, 0)),        # b2
        ],
        out_specs=pl.BlockSpec((tile_n, c), lambda i: (i, 0)),
        compiler_params=pltpu.CompilerParams(
            dimension_semantics=("parallel",)),
    )(x, w1, b1, w2, b2)
    return out[:n]


def head_reference(x, w1, b1, w2, b2):
    """Pure-JAX reference of the ORIGINAL (un-rewritten) forward pass."""
    n, m = x.shape
    c = w1.shape[0]
    v1 = jnp.broadcast_to(x[:, :, None], (n, m, c))               # (N, M, C)
    h1 = jnp.dot(v1, w1, preferred_element_type=jnp.float32) + b1 # (N, M, C)
    v2 = x[:, :, None, None] * h1[:, None, :, :]                  # (N, M, M, C)
    h2 = jnp.dot(v2, w2, preferred_element_type=jnp.float32) + b2 # (N, M, M, C)
    return jnp.trace(h2, axis1=1, axis2=2)                        # (N, C)


if __name__ == "__main__":
    N, M, C = 256, 8, 32          # n points, m spatial dims, channel width
    TILE_N = 64                   # 4 grid steps, "parallel" over N

    key = jax.random.PRNGKey(0)
    kx, k1, k2, k3, k4 = jax.random.split(key, 5)
    x = jax.random.normal(kx, (N, M), dtype=jnp.float32)

    # Deterministic, PyTorch-Linear-style init: U(-1/sqrt(C), 1/sqrt(C)).
    lim = float(1.0 / (C ** 0.5))
    w1 = jax.random.uniform(k1, (C, C), jnp.float32, -lim, lim)
    b1 = jax.random.uniform(k2, (1, C), jnp.float32, -lim, lim)
    w2 = jax.random.uniform(k3, (C, C), jnp.float32, -lim, lim)
    b2 = jax.random.uniform(k4, (1, C), jnp.float32, -lim, lim)

    out = head_forward(x, w1, b1, w2, b2, tile_n=TILE_N)
    out = jax.block_until_ready(out)

    ref = head_reference(x, w1, b1, w2, b2)
    assert out.shape == (N, C), out.shape
    assert jnp.allclose(out, ref, atol=2e-3, rtol=2e-3), (
        float(jnp.max(jnp.abs(out - ref))))
    print("KERNEL_OK")
</pallas_src>

<mosaic_0001>
module attributes {stable_mosaic.version = 11 : i64} {
  func.func @head_kernel(%arg0: i32, %arg1: memref<64x8xf32, #tpu.memory_space<vmem>>, %arg2: memref<32x32xf32, #tpu.memory_space<vmem>>, %arg3: memref<1x32xf32, #tpu.memory_space<vmem>>, %arg4: memref<32x32xf32, #tpu.memory_space<vmem>>, %arg5: memref<1x32xf32, #tpu.memory_space<vmem>>, %arg6: memref<64x32xf32, #tpu.memory_space<vmem>>) attributes {dimension_semantics = [#tpu.dimension_semantics<parallel>], iteration_bounds = array<i64: 4>, scalar_prefetch = 0 : i64, scratch_operands = 0 : i64, tpu.core_type = #tpu.core_type<tc>, window_params = [{transform_indices = @transform_0, window_bounds = array<i64: 64, 8>}, {pipeline_mode = #tpu.pipeline_mode<synchronous>, transform_indices = @transform_1, window_bounds = array<i64: 32, 32>}, {pipeline_mode = #tpu.pipeline_mode<synchronous>, transform_indices = @transform_2, window_bounds = array<i64: 1, 32>}, {pipeline_mode = #tpu.pipeline_mode<synchronous>, transform_indices = @transform_3, window_bounds = array<i64: 32, 32>}, {pipeline_mode = #tpu.pipeline_mode<synchronous>, transform_indices = @transform_4, window_bounds = array<i64: 1, 32>}, {transform_indices = @transform_5, window_bounds = array<i64: 64, 32>}]} {
    %c0 = arith.constant 0 : index
    %c0_0 = arith.constant 0 : index
    %0 = vector.load %arg1[%c0, %c0_0] : memref<64x8xf32, #tpu.memory_space<vmem>>, vector<64x8xf32>
    %c0_1 = arith.constant 0 : index
    %c0_2 = arith.constant 0 : index
    %1 = vector.load %arg2[%c0_1, %c0_2] : memref<32x32xf32, #tpu.memory_space<vmem>>, vector<32x32xf32>
    %cst = arith.constant dense<0.000000e+00> : vector<32xf32>
    %2 = vector.multi_reduction <add>, %1, %cst [0] : vector<32x32xf32> to vector<32xf32>
    %3 = vector.shape_cast %2 : vector<32xf32> to vector<1x32xf32>
    %cst_3 = arith.constant dense<0.000000e+00> : vector<64xf32>
    %4 = vector.multi_reduction <add>, %0, %cst_3 [1] : vector<64x8xf32> to vector<64xf32>
    %5 = vector.shape_cast %4 : vector<64xf32> to vector<64x1xf32>
    %6 = arith.mulf %0, %0 : vector<64x8xf32>
    %cst_4 = arith.constant dense<0.000000e+00> : vector<64xf32>
    %7 = vector.multi_reduction <add>, %6, %cst_4 [1] : vector<64x8xf32> to vector<64xf32>
    %8 = vector.shape_cast %7 : vector<64xf32> to vector<64x1xf32>
    %9 = vector.broadcast %8 : vector<64x1xf32> to vector<64x32xf32>
    %10 = vector.broadcast %3 : vector<1x32xf32> to vector<64x32xf32>
    %11 = arith.mulf %9, %10 : vector<64x32xf32>
    %c0_5 = arith.constant 0 : index
    %c0_6 = arith.constant 0 : index
    %12 = vector.load %arg3[%c0_5, %c0_6] : memref<1x32xf32, #tpu.memory_space<vmem>>, vector<1x32xf32>
    %13 = vector.broadcast %5 : vector<64x1xf32> to vector<64x32xf32>
    %14 = vector.broadcast %12 : vector<1x32xf32> to vector<64x32xf32>
    %15 = arith.mulf %13, %14 : vector<64x32xf32>
    %16 = arith.addf %11, %15 : vector<64x32xf32>
    %c0_7 = arith.constant 0 : index
    %c0_8 = arith.constant 0 : index
    %17 = vector.load %arg4[%c0_7, %c0_8] : memref<32x32xf32, #tpu.memory_space<vmem>>, vector<32x32xf32>
    %cst_9 = arith.constant dense<0.000000e+00> : vector<64x32xf32>
    %18 = tpu.matmul %16, %17, %cst_9 {dimension_numbers = #tpu.dot_dimension_numbers<[1], [0], [0], [1], [0, 0, 1, 1], [], []>} : vector<64x32xf32>, vector<32x32xf32>, vector<64x32xf32> -> vector<64x32xf32>
    %c0_10 = arith.constant 0 : index
    %c0_11 = arith.constant 0 : index
    %19 = vector.load %arg5[%c0_10, %c0_11] : memref<1x32xf32, #tpu.memory_space<vmem>>, vector<1x32xf32>
    %cst_12 = arith.constant 8.000000e+00 : f32
    %20 = vector.broadcast %cst_12 : f32 to vector<1x32xf32>
    %21 = arith.mulf %20, %19 : vector<1x32xf32>
    %22 = vector.broadcast %21 : vector<1x32xf32> to vector<64x32xf32>
    %23 = arith.addf %18, %22 : vector<64x32xf32>
    %c0_13 = arith.constant 0 : index
    %c0_14 = arith.constant 0 : index
    %24 = vector.load %arg6[%c0_13, %c0_14] : memref<64x32xf32, #tpu.memory_space<vmem>>, vector<64x32xf32>
    tpu.vector_store %arg6[%c0_13, %c0_14], %23 {strides = array<i32>} : memref<64x32xf32, #tpu.memory_space<vmem>>, vector<64x32xf32>,
    return
  }
  func.func @transform_0(%arg0: i32) -> (i32, i32) {
    %c0_i32 = arith.constant 0 : i32
    %c0_i32_0 = arith.constant 0 : i32
    return %arg0, %c0_i32 : i32, i32
  }
  func.func @transform_1(%arg0: i32) -> (i32, i32) {
    %c0_i32 = arith.constant 0 : i32
    %c0_i32_0 = arith.constant 0 : i32
    %c0_i32_1 = arith.constant 0 : i32
    return %c0_i32, %c0_i32_0 : i32, i32
  }
  func.func @transform_2(%arg0: i32) -> (i32, i32) {
    %c0_i32 = arith.constant 0 : i32
    %c0_i32_0 = arith.constant 0 : i32
    %c0_i32_1 = arith.constant 0 : i32
    return %c0_i32, %c0_i32_0 : i32, i32
  }
  func.func @transform_3(%arg0: i32) -> (i32, i32) {
    %c0_i32 = arith.constant 0 : i32
    %c0_i32_0 = arith.constant 0 : i32
    %c0_i32_1 = arith.constant 0 : i32
    return %c0_i32, %c0_i32_0 : i32, i32
  }
  func.func @transform_4(%arg0: i32) -> (i32, i32) {
    %c0_i32 = arith.constant 0 : i32
    %c0_i32_0 = arith.constant 0 : i32
    %c0_i32_1 = arith.constant 0 : i32
    return %c0_i32, %c0_i32_0 : i32, i32
  }
  func.func @transform_5(%arg0: i32) -> (i32, i32) {
    %c0_i32 = arith.constant 0 : i32
    %c0_i32_0 = arith.constant 0 : i32
    return %arg0, %c0_i32 : i32, i32
  }
}

</mosaic_0001>

<bundles_post_ra>
// kernel: tpu_custom_call.1
= control target key start
LH: loop header
LB: loop body
LE: loop exit
PB: predicated region body
PF: predicated region fallthrough
CT: control target
= control target key end

     0   :  { %s555_s18 = smov 0   ;;  %s655_s0 = inlined_call_operand.vmem [shape: f32[256,8], index: 0, kind: input, shape index: {}]   ;;  %s656_s1 = inlined_call_operand.vmem [shape: f32[32,32], index: 1, kind: input, shape index: {}]   ;;  %s657_s2 = inlined_call_operand.vmem [shape: f32[1,32], index: 2, kind: input, shape index: {}]   ;;  %s658_s3 = inlined_call_operand.vmem [shape: f32[32,32], index: 3, kind: input, shape index: {}]   ;;  %s659_s4 = inlined_call_operand.vmem [shape: f32[1,32], index: 4, kind: input, shape index: {}]   ;;  %s660_s5 = inlined_call_operand.vmem [shape: f32[256,32], index: 5, kind: output, shape index: {}]  }
   0x1 LB: > { %s477_s19 = sadd.s32 4294967295, %s523_s18   ;;  %p481_p0 = scmp.ge.s32.totalorder %s523_s18, 1  ;;  %s523_s18 = sphi %s555_s18, %s15_s18  }
   0x2   : > { %p188_p1 = scmp.lt.s32.totalorder %s523_s18, 5 }
   0x4   : > { %p189_p2 = pnand %p481_p0, %p188_p1 }
   0x5   : > { %s482_s20 = sshll.u32 (!%p189_p2), %s477_s19, 3 }
   0x6   : > { %192 = sbr.rel (%p189_p2) target bundleno = 305 (0x131), region = 40  ;;  %p217_p3 = scmp.lt.s32.totalorder (!%p189_p2), %s482_s20, 31 }
   0xb   : > { %s662_s20 = smov (!%p217_p3, %s482_s20), 31  ;;  %vm254_vm0 = vcmask 64512   ;;  %v342_v12 = vld [vmem:[%s658_s3 + $0x18] sm:$0xff]  ;;  %v236_v33 = vld [vmem:[%s656_s1] sm:$0xff]  ;;  %v237_v34 = vld [vmem:[%s656_s1 + $0x8] sm:$0xff]  ;;  %vm240_vm1 = vcmask 261120  }
   0xc   : > { %s483_s21 = sshll.u32 %s662_s20, 3  ;;  %497 = vmatpush.msra.mxu2 %v342_v12  ;;  %498 = vmatpush.msra.mxu3 %v342_v12  ;;  %v241_v35 = vsel %vm240_vm1, %v236_v33, 0.0  ;;  %v242_v36 = vsel %vm240_vm1, %v237_v34, 0.0  ;;  %v238_v37 = vld [vmem:[%s656_s1 + $0x10] sm:$0xff]  ;;  %v239_v41 = vld [vmem:[%s656_s1 + $0x18] sm:$0xff]  ;;  %v340_v43 = vld [vmem:[%s658_s3 + $0x8] sm:$0xff] }
   0xd   : > { %s571_s24 = scalar_lea.vmem %s655_s0, %s483_s21  ;;  %384 = vmatpush.msra.mxu0 %v342_v12  ;;  %496 = vmatpush.msra.mxu1 %v342_v12  ;;  %v243_v38 = vadd.f32 %v242_v36, %v241_v35  ;;  %v244_v39 = vsel %vm240_vm1, %v238_v37, 0.0  ;;  %v341_v40 = vld [vmem:[%s658_s3 + $0x10] sm:$0xff]  ;;  %v246_v44 = vsel %vm240_vm1, %v239_v41, 0.0  ;;  %v339_v45 = vld [vmem:[%s658_s3] sm:$0xff]  ;;  %s226_s25 = scalar_lea.vmem %s660_s5, %s483_s21 }
   0xe   : > { %v232_v0 = vld [vmem:[%s571_s24 + $0x20] sm:$0xff]  ;;  %v234_v5 = vld [vmem:[%s571_s24 + $0x30] sm:$0xff]  ;;  %v233_v14 = vld [vmem:[%s571_s24 + $0x28] sm:$0xff]  ;;  %500 = vmatpush.msra.mxu2 %v341_v40  ;;  %501 = vmatpush.msra.mxu3 %v341_v40 }
   0xf   : > { %v228_v1 = vld [vmem:[%s571_s24] sm:$0xff]  ;;  %v267_v2 = vsel %vm254_vm0, %v232_v0, 0.0  ;;  %v283_v4 = vmul.f32 %v232_v0, %v232_v0  ;;  %v230_v7 = vld [vmem:[%s571_s24 + $0x10] sm:$0xff]  ;;  %v285_v8 = vmul.f32 %v234_v5, %v234_v5  ;;  %v273_v9 = vsel %vm254_vm0, %v234_v5, 0.0  ;;  %v235_v18 = vld [vmem:[%s571_s24 + $0x38] sm:$0xff]  ;;  %385 = vmatpush.msra.mxu0 %v341_v40  ;;  %499 = vmatpush.msra.mxu1 %v341_v40 }
  0x10   : > { %v255_v3 = vsel %vm254_vm0, %v228_v1, 0.0  ;;  %268 = vadd.xlane.f32.xlu0 %v267_v2  ;;  %v261_v10 = vsel %vm254_vm0, %v230_v7, 0.0  ;;  %v279_v13 = vmul.f32 %v228_v1, %v228_v1  ;;  %v281_v15 = vmul.f32 %v230_v7, %v230_v7  ;;  %v229_v24 = vld [vmem:[%s571_s24 + $0x8] sm:$0xff]  ;;  %v231_v29 = vld [vmem:[%s571_s24 + $0x18] sm:$0xff]  ;;  %503 = vmatpush.msra.mxu2 %v340_v43  ;;  %v516_v52 = vld [vmem:[%s657_s2] ss:$0 sm:$0xff] }
  0x11   : > { %256 = vadd.xlane.f32.xlu2 %v255_v3  ;;  %v299_v6 = vsel %vm254_vm0, %v283_v4, 0.0  ;;  %v305_v11 = vsel %vm254_vm0, %v285_v8, 0.0  ;;  %v270_v17 = vsel %vm254_vm0, %v233_v14, 0.0  ;;  %v286_v20 = vmul.f32 %v235_v18, %v235_v18  ;;  %504 = vmatpush.msra.mxu3 %v340_v43 }
  0x12   : > { %300 = vadd.xlane.f32.xlu1 %v299_v6  ;;  %v287_v16 = vsel %vm254_vm0, %v279_v13, 0.0  ;;  %v293_v19 = vsel %vm254_vm0, %v281_v15, 0.0  ;;  %v284_v21 = vmul.f32 %v233_v14, %v233_v14  ;;  %v276_v22 = vsel %vm254_vm0, %v235_v18, 0.0  ;;  %386 = vmatpush.msra.mxu0 %v340_v43 }
  0x13   : > { %v308_v23 = vsel %vm254_vm0, %v286_v20, 0.0  ;;  %v280_v26 = vmul.f32 %v229_v24, %v229_v24  ;;  %v258_v27 = vsel %vm254_vm0, %v229_v24, 0.0  ;;  %v264_v30 = vsel %vm254_vm0, %v231_v29, 0.0  ;;  %502 = vmatpush.msra.mxu1 %v340_v43  ;;  %506 = vmatpush.msra.mxu2 %v339_v45 }
  0x14   : > { %v302_v25 = vsel %vm254_vm0, %v284_v21, 0.0  ;;  %v282_v31 = vmul.f32 %v231_v29, %v231_v29  ;;  %v245_v42 = vadd.f32 %v244_v39, %v243_v38  ;;  %507 = vmatpush.msra.mxu3 %v339_v45  ;;  %387 = vmatpush.msra.mxu0 %v339_v45 }
  0x15   : > { %v290_v28 = vsel %vm254_vm0, %v280_v26, 0.0  ;;  %505 = vmatpush.msra.mxu1 %v339_v45 }
  0x16   : > { %v296_v32 = vsel %vm254_vm0, %v282_v31, 0.0  ;;  %v247_v46 = vadd.f32 %v246_v44, %v245_v42 }
  0x18   : > { %274 = vadd.xlane.f32.xlu0 %v273_v9  ;;  %v248_v47 = vrot.slane %v247_v46, 4 }
  0x19   : > { %262 = vadd.xlane.f32.xlu2 %v261_v10 }
  0x1a   : > { %306 = vadd.xlane.f32.xlu1 %v305_v11  ;;  %v249_v48 = vadd.f32 %v248_v47, %v247_v46 }
  0x1c   : > { %v250_v49 = vrot.slane %v249_v48, 2 }
  0x1e   : > { %v251_v50 = vadd.f32 %v250_v49, %v249_v48 }
  0x20   : > { %288 = vadd.xlane.f32.xlu0 %v287_v16  ;;  %v252_v51 = vrot.slane %v251_v50, 1 }
  0x21   : > { %271 = vadd.xlane.f32.xlu2 %v270_v17 }
  0x22   : > { %294 = vadd.xlane.f32.xlu1 %v293_v19  ;;  %v253_v53 = vadd.f32 %v252_v51, %v251_v50 }
  0x28   : > { %277 = vadd.xlane.f32.xlu0 %v276_v22 }
  0x29   : > { %309 = vadd.xlane.f32.xlu2 %v308_v23 }
  0x2a   : > { %303 = vadd.xlane.f32.xlu1 %v302_v25 }
  0x30   : > { %259 = vadd.xlane.f32.xlu0 %v258_v27 }
  0x31   : > { %291 = vadd.xlane.f32.xlu2 %v290_v28 }
  0x32   : > { %265 = vadd.xlane.f32.xlu1 %v264_v30  ;;  %v343_v30 = vld [vmem:[%s659_s4] sm:$0x1] }
  0x33   : > { %v344_v31 = vmul.f32 8.0, %v343_v30 }
  0x38   : > { %297 = vadd.xlane.f32.xlu0 %v296_v32  ;;  %v346_v32 = vperm.slane %v344_v31, 0 }
  0x83   : > { %v269_v54 = vpop.xlane.xlu0 %268 }
  0x84   : > { %v257_v55 = vpop.xlane.xlu2 %256  ;;  %v327_v57 = vmul.f32 %v516_v52, %v269_v54 }
  0x85   : > { %v301_v56 = vpop.xlane.xlu1 %300  ;;  %v323_v4 = vmul.f32 %v516_v52, %v257_v55 }
  0x86   : > { %v315_v58 = vmul.f32 %v301_v56, %v253_v53 }
  0x88   : > { %v335_v59 = vadd.f32 %v327_v57, %v315_v58 }
  0x8a   : > { %490 = vmatmul.msk.f32.vlgmr.msra.gmra.mxu2 %vm240_vm1, %v335_v59 }
  0x8b   : > { %v275_v60 = vpop.xlane.xlu0 %274 }
  0x8c   : > { %v263_v61 = vpop.xlane.xlu2 %262  ;;  %v329_v63 = vmul.f32 %v516_v52, %v275_v60 }
  0x8d   : > { %v307_v62 = vpop.xlane.xlu1 %306  ;;  %v325_v7 = vmul.f32 %v516_v52, %v263_v61 }
  0x8e   : > { %v317_v0 = vmul.f32 %v307_v62, %v253_v53 }
  0x90   : > { %v337_v1 = vadd.f32 %v329_v63, %v317_v0 }
  0x92   : > { %492 = vmatmul.msk.f32.vlgmr.msra.gmra.mxu3 %vm240_vm1, %v337_v1 }
  0x93   : > { %v289_v2 = vpop.xlane.xlu0 %288 }
  0x94   : > { %v272_v3 = vpop.xlane.xlu2 %271  ;;  %v311_v5 = vmul.f32 %v289_v2, %v253_v53 }
  0x95   : > { %v295_v6 = vpop.xlane.xlu1 %294  ;;  %v328_v16 = vmul.f32 %v516_v52, %v272_v3 }
  0x96   : > { %v331_v8 = vadd.f32 %v323_v4, %v311_v5  ;;  %v313_v9 = vmul.f32 %v295_v6, %v253_v53 }
  0x98   : > { %v333_v10 = vadd.f32 %v325_v7, %v313_v9  ;;  %486 = vmatmul.msk.f32.vlgmr.msra.gmra.mxu0 %vm240_vm1, %v331_v8 }
  0x9a   : > { %488 = vmatmul.msk.f32.vlgmr.msra.gmra.mxu1 %vm240_vm1, %v333_v10 }
  0x9b   : > { %v278_v11 = vpop.xlane.xlu0 %277 }
  0x9c   : > { %v310_v12 = vpop.xlane.xlu2 %309  ;;  %v330_v13 = vmul.f32 %v516_v52, %v278_v11 }
  0x9d   : > { %v318_v14 = vmul.f32 %v310_v12, %v253_v53  ;;  %v304_v15 = vpop.xlane.xlu1 %303 }
  0x9e   : > { %v316_v18 = vmul.f32 %v304_v15, %v253_v53 }
  0x9f   : > { %v338_v17 = vadd.f32 %v330_v13, %v318_v14 }
  0xa0   : > { %v336_v19 = vadd.f32 %v328_v16, %v316_v18 }
  0xa1   : > { %493 = vmatmul.msk.f32.gmra.mxu3 %vm240_vm1, %v338_v17 }
  0xa2   : > { %491 = vmatmul.msk.f32.gmra.mxu2 %vm240_vm1, %v336_v19 }
  0xa3   : > { %v260_v20 = vpop.xlane.xlu0 %259 }
  0xa4   : > { %v292_v21 = vpop.xlane.xlu2 %291  ;;  %v324_v22 = vmul.f32 %v516_v52, %v260_v20 }
  0xa5   : > { %v312_v23 = vmul.f32 %v292_v21, %v253_v53  ;;  %v266_v25 = vpop.xlane.xlu1 %265 }
  0xa6   : > { %v326_v26 = vmul.f32 %v516_v52, %v266_v25 }
  0xa7   : > { %v332_v24 = vadd.f32 %v324_v22, %v312_v23 }
  0xa9   : > { %487 = vmatmul.msk.f32.gmra.mxu0 %vm240_vm1, %v332_v24 }
  0xab   : > { %v298_v27 = vpop.xlane.xlu0 %297 }
  0xac   : > { %v314_v28 = vmul.f32 %v298_v27, %v253_v53 }
  0xae   : > { %v334_v29 = vadd.f32 %v326_v26, %v314_v28 }
  0xb0   : > { %489 = vmatmul.msk.f32.gmra.mxu1 %vm240_vm1, %v334_v29 }
 0x10d   : > { %v401_v33 = vpop.f32.mrf.mxu2 }
 0x10e   : > { %v402_v34 = vadd.f32 %v401_v33, %v346_v32 }
 0x110   : > { %417 = vst.msk [vmem:[%s226_s25 + $0x20] sm:$0xff] %vm240_vm1, %v402_v34 }
 0x115   : > { %v389_v35 = vpop.f32.mrf.mxu0  ;;  %v407_v36 = vpop.f32.mrf.mxu3 }
 0x116   : > { %v390_v37 = vadd.f32 %v389_v35, %v346_v32  ;;  %v408_v38 = vadd.f32 %v407_v36, %v346_v32 }
 0x117   : > { %v395_v39 = vpop.f32.mrf.mxu1 }
 0x118   : > { %413 = vst.msk [vmem:[%s226_s25] sm:$0xff] %vm240_vm1, %v390_v37  ;;  %v396_v40 = vadd.f32 %v395_v39, %v346_v32 }
 0x119   : > { %419 = vst.msk [vmem:[%s226_s25 + $0x30] sm:$0xff] %vm240_vm1, %v408_v38 }
 0x11a   : > { %415 = vst.msk [vmem:[%s226_s25 + $0x10] sm:$0xff] %vm240_vm1, %v396_v40 }
 0x124   : > { %v410_v41 = vpop.f32.mrf.mxu3 }
 0x125   : > { %v411_v42 = vadd.f32 %v410_v41, %v346_v32  ;;  %v404_v44 = vpop.f32.mrf.mxu2 }
 0x126   : > { %v392_v43 = vpop.f32.mrf.mxu0  ;;  %v405_v46 = vadd.f32 %v404_v44, %v346_v32 }
 0x127   : > { %420 = vst.msk [vmem:[%s226_s25 + $0x38] sm:$0xff] %vm240_vm1, %v411_v42  ;;  %v393_v45 = vadd.f32 %v392_v43, %v346_v32 }
 0x128   : > { %418 = vst.msk [vmem:[%s226_s25 + $0x28] sm:$0xff] %vm240_vm1, %v405_v46 }
 0x129   : > { %414 = vst.msk [vmem:[%s226_s25 + $0x8] sm:$0xff] %vm240_vm1, %v393_v45 }
 0x12d   : > { %v398_v47 = vpop.f32.mrf.mxu1 }
 0x12e   : > { %v399_v48 = vadd.f32 %v398_v47, %v346_v32 }
 0x130   : > { %416 = vst.msk [vmem:[%s226_s25 + $0x18] sm:$0xff] %vm240_vm1, %v399_v48 }
 0x131 PF: > { %s15_s18 = sadd.s32 1, %s523_s18  }
 0x132   : > { %p12_p4 = scmp.ge.s32.totalorder %s15_s18, 6  }
 0x134   :  { %14 = sbr.rel (!%p12_p4) target bundleno = 1 (0x1), region = 70 }

</bundles_post_ra>
